<compile_context>
chip_gen: v5e
topology: v5e:2x2
jax: 0.10.0
libtpu: 0.0.40
codegen_flags: <defaults>
</compile_context>

<pallas_src>
import numpy as np

import jax
import jax.numpy as jnp
from jax.experimental import pallas as pl
from jax.experimental.pallas import tpu as pltpu


# --------------------------------------------------------------------------
# Kernel
# --------------------------------------------------------------------------
def _upfirdn_mm_kernel(mh_ref, mwt_ref, x_ref, o_ref):
    """out[c] = Mh @ x[c] @ Mw^T for each channel c of the block.

    mh_ref : (Ho, Hi) f32 resampling matrix for the H axis.
    mwt_ref: (Wi, Wo) f32 resampling matrix for the W axis, pre-transposed.
    x_ref  : (tc, Hi, Wi) input block (original, un-upsampled, un-padded).
    o_ref  : (tc, Ho, Wo) output block (final, already down-strided).
    """
    mh = mh_ref[...]          # (Ho, Hi) f32
    mwt = mwt_ref[...]        # (Wi, Wo) f32
    tc = x_ref.shape[0]

    def one_channel(c):
        xc = x_ref[c, :, :].astype(jnp.float32)                        # (Hi, Wi)
        t = jnp.dot(mh, xc, preferred_element_type=jnp.float32)        # (Ho, Wi)
        oc = jnp.dot(t, mwt, preferred_element_type=jnp.float32)       # (Ho, Wo)
        o_ref[c, :, :] = oc.astype(o_ref.dtype)

    if tc <= 16:
        # Short static loop -> fully unrolled, visible to the LLO scheduler.
        for c in range(tc):
            one_channel(c)
    else:
        def body(c, carry):
            one_channel(c)
            return carry
        jax.lax.fori_loop(0, tc, body, 0)


# --------------------------------------------------------------------------
# Wrapper helpers
# --------------------------------------------------------------------------
def _resample_matrix(taps, in_len, up, down, pad0, pad1):
    """Matrix M (out_len, in_len) with M[o, r] = taps[up*r + pad0 - o*down].

    Encodes zero-insertion upsample, pad/crop (negative pads crop), the 1-D
    FIR cross-correlation and the ::down stride along one axis.
    """
    taps = np.asarray(taps, dtype=np.float64)
    t_len = taps.shape[0]
    conv_len = in_len * up + pad0 + pad1 - t_len + 1
    assert conv_len > 0, "filter larger than the (upsampled, padded) input"
    out_len = -(-conv_len // down)                 # ceil(conv_len / down)
    o = np.arange(out_len)[:, None]
    r = np.arange(in_len)[None, :]
    idx = up * r + pad0 - down * o                 # tap index hit by (o, r)
    valid = (idx >= 0) & (idx < t_len)
    m = np.where(valid, taps[np.clip(idx, 0, t_len - 1)], 0.0)
    return m.astype(np.float32)


def _vmem_budget_bytes():
    """(per-block working-set budget, vmem_limit_bytes), generation aware."""
    cap = 64 << 20                                 # v7x per-TC VMEM (smallest)
    try:
        info = pltpu.get_tpu_info()
        cap = int(getattr(info, "vmem_capacity_bytes", cap))
    except Exception:
        pass                                       # fall back to the safe 64 MiB
    budget = int(cap * 0.45)                       # double-buffered working set
    limit = min(int(cap * 0.90), 128 << 20)
    return budget, limit


def _pick_channel_tile(n, h, w, ho, wo, in_itemsize, out_itemsize, budget_bytes):
    """Channel-tile size; no divisor-of-n constraint (grid uses cdiv)."""
    # Double-buffered input/output blocks scale with tc; the resampling
    # matrices and the per-channel f32 temporaries (xc, t, oc) do not.
    per_c = 2 * h * w * in_itemsize + 2 * ho * wo * out_itemsize
    fixed = 2 * 4 * (ho * h + w * wo) + 4 * (h * w + ho * w + ho * wo)
    tc = max(1, min(n, (budget_bytes - fixed) // max(per_c, 1)))
    if n >= 2:
        # Keep >= 2 grid blocks so the ("parallel",) axis can actually split
        # across the two TensorCores on v7x (harmless on v5e/v6e).
        tc = min(tc, -(-n // 2))
    return int(tc)


# --------------------------------------------------------------------------
# Module
# --------------------------------------------------------------------------
class Upfirdn2d:
    """JAX/Pallas port of the PyTorch Upfirdn2d module."""

    def __init__(self, resample_filter=[1, 3, 3, 1], up=1, down=1,
                 padding=0, gain=1, **kwargs):
        assert isinstance(resample_filter, list)
        f1d = jnp.asarray(resample_filter, dtype=jnp.float32)
        f2d = jnp.outer(f1d, f1d)
        f2d = f2d / jnp.sum(f2d)
        self.filter = f2d                      # registered-buffer equivalent
        self.up = int(up)
        self.down = int(down)
        self.padding = [padding] * 4 if isinstance(padding, int) else list(padding)
        assert isinstance(self.padding, list) and len(self.padding) == 4
        self.gain = gain

        # 1-D taps: outer(k, k) / sum(outer) * gain == outer(k/s, k/s * gain).
        k = np.asarray(resample_filter, dtype=np.float64)
        k = k / k.sum()
        scale = float(gain) ** (2 / 2)         # filter.ndim == 2
        self._taps_h = k
        self._taps_w = k * scale

    def __call__(self, x):
        B, C, H, W = x.shape
        padx0, padx1, pady0, pady1 = self.padding
        up, down = self.up, self.down

        # Constant per-axis resampling matrices (fuse up + pad/crop + FIR + down).
        mh = _resample_matrix(self._taps_h, H, up, down, pady0, pady1)   # (Ho, H)
        mw = _resample_matrix(self._taps_w, W, up, down, padx0, padx1)   # (Wo, W)
        Ho = mh.shape[0]
        Wo = mw.shape[0]
        mh = jnp.asarray(mh, dtype=jnp.float32)
        mwt = jnp.asarray(mw.T, dtype=jnp.float32)                       # (W, Wo)

        N = B * C
        x_flat = x.reshape(N, H, W)

        in_sz = jnp.dtype(x.dtype).itemsize
        out_sz = in_sz
        budget, vmem_limit = _vmem_budget_bytes()
        tc = _pick_channel_tile(N, H, W, Ho, Wo, in_sz, out_sz, budget)
        num_blocks = pl.cdiv(N, tc)

        flops = 2 * N * (Ho * H * W + Ho * W * Wo)
        bytes_accessed = (N * H * W * in_sz + N * Ho * Wo * out_sz
                          + 4 * (Ho * H + W * Wo))

        y = pl.pallas_call(
            _upfirdn_mm_kernel,
            out_shape=jax.ShapeDtypeStruct((N, Ho, Wo), x.dtype),
            grid_spec=pltpu.PrefetchScalarGridSpec(
                num_scalar_prefetch=0,
                grid=(num_blocks,),
                in_specs=[
                    # Constant block index -> the matrices are DMA'd once and
                    # kept resident in VMEM across all grid steps.
                    pl.BlockSpec((Ho, H), lambda i: (0, 0)),
                    pl.BlockSpec((W, Wo), lambda i: (0, 0)),
                    pl.BlockSpec((tc, H, W), lambda i: (i, 0, 0)),
                ],
                out_specs=pl.BlockSpec((tc, Ho, Wo), lambda i: (i, 0, 0)),
            ),
            compiler_params=pltpu.CompilerParams(
                dimension_semantics=("parallel",),
                vmem_limit_bytes=vmem_limit,
            ),
            cost_estimate=pl.CostEstimate(
                flops=flops, transcendentals=0, bytes_accessed=bytes_accessed),
        )(mh, mwt, x_flat)

        return y.reshape(B, C, Ho, Wo)


# --------------------------------------------------------------------------
# Pure-jnp reference (mirrors the torch forward exactly)
# --------------------------------------------------------------------------
def _reference_upfirdn2d(layer: Upfirdn2d, x):
    B, C, H, W = x.shape
    up, down = layer.up, layer.down
    padx0, padx1, pady0, pady1 = layer.padding
    if up > 1:
        x = x.reshape(B, C, H, 1, W, 1)
        x = jnp.pad(x, ((0, 0), (0, 0), (0, 0), (0, up - 1),
                        (0, 0), (0, up - 1)))
        x = x.reshape(B, C, H * up, W * up)
    x = jnp.pad(x, ((0, 0), (0, 0),
                    (max(pady0, 0), max(pady1, 0)),
                    (max(padx0, 0), max(padx1, 0))))
    x = x[:, :,
          max(-pady0, 0): x.shape[2] - max(-pady1, 0),
          max(-padx0, 0): x.shape[3] - max(-padx1, 0)]
    f = layer.filter * (float(layer.gain) ** (layer.filter.ndim / 2))
    fh, fw = f.shape
    Hc = x.shape[2] - fh + 1
    Wc = x.shape[3] - fw + 1
    out = jnp.zeros((B, C, Hc, Wc), jnp.float32)
    xf = x.astype(jnp.float32)
    for ky in range(fh):
        for kx in range(fw):
            out = out + f[ky, kx] * xf[:, :, ky:ky + Hc, kx:kx + Wc]
    return out[:, :, ::down, ::down].astype(x.dtype)


# --------------------------------------------------------------------------
# Self-test
# --------------------------------------------------------------------------
if __name__ == "__main__":
    key = jax.random.PRNGKey(0)
    x = jax.random.normal(key, (2, 4, 16, 16), dtype=jnp.float32)

    # Plain 4x4 FIR (up=1, down=1, pad=0).
    layer = Upfirdn2d(resample_filter=[1, 3, 3, 1])
    y = jax.block_until_ready(layer(x))
    y_ref = _reference_upfirdn2d(layer, x)
    assert y.shape == y_ref.shape
    assert jnp.allclose(y, y_ref, atol=1e-4, rtol=1e-4)

    # StyleGAN-style 2x upsample with padding and gain.
    layer_up = Upfirdn2d(resample_filter=[1, 3, 3, 1], up=2, padding=2, gain=4)
    y_up = jax.block_until_ready(layer_up(x))
    y_up_ref = _reference_upfirdn2d(layer_up, x)
    assert y_up.shape == y_up_ref.shape
    assert jnp.allclose(y_up, y_up_ref, atol=1e-4, rtol=1e-4)

    # 2x downsample.
    layer_dn = Upfirdn2d(resample_filter=[1, 3, 3, 1], down=2, padding=1)
    y_dn = jax.block_until_ready(layer_dn(x))
    y_dn_ref = _reference_upfirdn2d(layer_dn, x)
    assert y_dn.shape == y_dn_ref.shape
    assert jnp.allclose(y_dn, y_dn_ref, atol=1e-4, rtol=1e-4)

    # Asymmetric padding including a crop (negative pad) + upsample + gain.
    layer_asym = Upfirdn2d(resample_filter=[1, 3, 3, 1], up=2,
                           padding=[1, -1, 2, 0], gain=2)
    y_as = jax.block_until_ready(layer_asym(x))
    y_as_ref = _reference_upfirdn2d(layer_asym, x)
    assert y_as.shape == y_as_ref.shape
    assert jnp.allclose(y_as, y_as_ref, atol=1e-4, rtol=1e-4)

    # Larger channel count: exercises the fori_loop path and a multi-block grid.
    x_big = jax.random.normal(jax.random.PRNGKey(1), (2, 24, 16, 16),
                              dtype=jnp.float32)
    y_big = jax.block_until_ready(layer_up(x_big))
    y_big_ref = _reference_upfirdn2d(layer_up, x_big)
    assert y_big.shape == y_big_ref.shape
    assert jnp.allclose(y_big, y_big_ref, atol=1e-4, rtol=1e-4)

    print("KERNEL_OK")
</pallas_src>

<mosaic_0001>
module attributes {stable_mosaic.version = 11 : i64} {
  func.func @_upfirdn_mm_kernel(%arg0: i32, %arg1: memref<13x16xf32, #tpu.memory_space<vmem>>, %arg2: memref<16x13xf32, #tpu.memory_space<vmem>>, %arg3: memref<4x16x16xf32, #tpu.memory_space<vmem>>, %arg4: memref<4x13x13xf32, #tpu.memory_space<vmem>>) attributes {dimension_semantics = [#tpu.dimension_semantics<parallel>], iteration_bounds = array<i64: 2>, scalar_prefetch = 0 : i64, scratch_operands = 0 : i64, tpu.core_type = #tpu.core_type<tc>, window_params = [{pipeline_mode = #tpu.pipeline_mode<synchronous>, transform_indices = @transform_0, window_bounds = array<i64: 13, 16>}, {pipeline_mode = #tpu.pipeline_mode<synchronous>, transform_indices = @transform_1, window_bounds = array<i64: 16, 13>}, {transform_indices = @transform_2, window_bounds = array<i64: 4, 16, 16>}, {transform_indices = @transform_3, window_bounds = array<i64: 4, 13, 13>}]} {
    %c0 = arith.constant 0 : index
    %c0_0 = arith.constant 0 : index
    %0 = vector.load %arg1[%c0, %c0_0] : memref<13x16xf32, #tpu.memory_space<vmem>>, vector<13x16xf32>
    %c0_1 = arith.constant 0 : index
    %c0_2 = arith.constant 0 : index
    %1 = vector.load %arg2[%c0_1, %c0_2] : memref<16x13xf32, #tpu.memory_space<vmem>>, vector<16x13xf32>
    %c0_3 = arith.constant 0 : index
    %c0_4 = arith.constant 0 : index
    %c0_5 = arith.constant 0 : index
    %2 = vector.load %arg3[%c0_3, %c0_4, %c0_5] : memref<4x16x16xf32, #tpu.memory_space<vmem>>, vector<1x16x16xf32>
    %3 = vector.shape_cast %2 : vector<1x16x16xf32> to vector<16x16xf32>
    %cst = arith.constant dense<0.000000e+00> : vector<13x16xf32>
    %4 = tpu.matmul %0, %3, %cst {dimension_numbers = #tpu.dot_dimension_numbers<[1], [0], [0], [1], [0, 0, 1, 1], [], []>} : vector<13x16xf32>, vector<16x16xf32>, vector<13x16xf32> -> vector<13x16xf32>
    %cst_6 = arith.constant dense<0.000000e+00> : vector<13x13xf32>
    %5 = tpu.matmul %4, %1, %cst_6 {dimension_numbers = #tpu.dot_dimension_numbers<[1], [0], [0], [1], [0, 0, 1, 1], [], []>} : vector<13x16xf32>, vector<16x13xf32>, vector<13x13xf32> -> vector<13x13xf32>
    %c0_7 = arith.constant 0 : index
    %c0_8 = arith.constant 0 : index
    %c0_9 = arith.constant 0 : index
    %6 = vector.load %arg4[%c0_7, %c0_8, %c0_9] : memref<4x13x13xf32, #tpu.memory_space<vmem>>, vector<1x13x13xf32>
    %7 = vector.shape_cast %6 : vector<1x13x13xf32> to vector<13x13xf32>
    %8 = vector.shape_cast %5 : vector<13x13xf32> to vector<1x13x13xf32>
    tpu.vector_store %arg4[%c0_7, %c0_8, %c0_9], %8 {strides = array<i32>} : memref<4x13x13xf32, #tpu.memory_space<vmem>>, vector<1x13x13xf32>,
    %c1 = arith.constant 1 : index
    %c0_10 = arith.constant 0 : index
    %c0_11 = arith.constant 0 : index
    %9 = vector.load %arg3[%c1, %c0_10, %c0_11] : memref<4x16x16xf32, #tpu.memory_space<vmem>>, vector<1x16x16xf32>
    %10 = vector.shape_cast %9 : vector<1x16x16xf32> to vector<16x16xf32>
    %cst_12 = arith.constant dense<0.000000e+00> : vector<13x16xf32>
    %11 = tpu.matmul %0, %10, %cst_12 {dimension_numbers = #tpu.dot_dimension_numbers<[1], [0], [0], [1], [0, 0, 1, 1], [], []>} : vector<13x16xf32>, vector<16x16xf32>, vector<13x16xf32> -> vector<13x16xf32>
    %cst_13 = arith.constant dense<0.000000e+00> : vector<13x13xf32>
    %12 = tpu.matmul %11, %1, %cst_13 {dimension_numbers = #tpu.dot_dimension_numbers<[1], [0], [0], [1], [0, 0, 1, 1], [], []>} : vector<13x16xf32>, vector<16x13xf32>, vector<13x13xf32> -> vector<13x13xf32>
    %c1_14 = arith.constant 1 : index
    %c0_15 = arith.constant 0 : index
    %c0_16 = arith.constant 0 : index
    %13 = vector.load %arg4[%c1_14, %c0_15, %c0_16] : memref<4x13x13xf32, #tpu.memory_space<vmem>>, vector<1x13x13xf32>
    %14 = vector.shape_cast %13 : vector<1x13x13xf32> to vector<13x13xf32>
    %15 = vector.shape_cast %12 : vector<13x13xf32> to vector<1x13x13xf32>
    tpu.vector_store %arg4[%c1_14, %c0_15, %c0_16], %15 {strides = array<i32>} : memref<4x13x13xf32, #tpu.memory_space<vmem>>, vector<1x13x13xf32>,
    %c2 = arith.constant 2 : index
    %c0_17 = arith.constant 0 : index
    %c0_18 = arith.constant 0 : index
    %16 = vector.load %arg3[%c2, %c0_17, %c0_18] : memref<4x16x16xf32, #tpu.memory_space<vmem>>, vector<1x16x16xf32>
    %17 = vector.shape_cast %16 : vector<1x16x16xf32> to vector<16x16xf32>
    %cst_19 = arith.constant dense<0.000000e+00> : vector<13x16xf32>
    %18 = tpu.matmul %0, %17, %cst_19 {dimension_numbers = #tpu.dot_dimension_numbers<[1], [0], [0], [1], [0, 0, 1, 1], [], []>} : vector<13x16xf32>, vector<16x16xf32>, vector<13x16xf32> -> vector<13x16xf32>
    %cst_20 = arith.constant dense<0.000000e+00> : vector<13x13xf32>
    %19 = tpu.matmul %18, %1, %cst_20 {dimension_numbers = #tpu.dot_dimension_numbers<[1], [0], [0], [1], [0, 0, 1, 1], [], []>} : vector<13x16xf32>, vector<16x13xf32>, vector<13x13xf32> -> vector<13x13xf32>
    %c2_21 = arith.constant 2 : index
    %c0_22 = arith.constant 0 : index
    %c0_23 = arith.constant 0 : index
    %20 = vector.load %arg4[%c2_21, %c0_22, %c0_23] : memref<4x13x13xf32, #tpu.memory_space<vmem>>, vector<1x13x13xf32>
    %21 = vector.shape_cast %20 : vector<1x13x13xf32> to vector<13x13xf32>
    %22 = vector.shape_cast %19 : vector<13x13xf32> to vector<1x13x13xf32>
    tpu.vector_store %arg4[%c2_21, %c0_22, %c0_23], %22 {strides = array<i32>} : memref<4x13x13xf32, #tpu.memory_space<vmem>>, vector<1x13x13xf32>,
    %c3 = arith.constant 3 : index
    %c0_24 = arith.constant 0 : index
    %c0_25 = arith.constant 0 : index
    %23 = vector.load %arg3[%c3, %c0_24, %c0_25] : memref<4x16x16xf32, #tpu.memory_space<vmem>>, vector<1x16x16xf32>
    %24 = vector.shape_cast %23 : vector<1x16x16xf32> to vector<16x16xf32>
    %cst_26 = arith.constant dense<0.000000e+00> : vector<13x16xf32>
    %25 = tpu.matmul %0, %24, %cst_26 {dimension_numbers = #tpu.dot_dimension_numbers<[1], [0], [0], [1], [0, 0, 1, 1], [], []>} : vector<13x16xf32>, vector<16x16xf32>, vector<13x16xf32> -> vector<13x16xf32>
    %cst_27 = arith.constant dense<0.000000e+00> : vector<13x13xf32>
    %26 = tpu.matmul %25, %1, %cst_27 {dimension_numbers = #tpu.dot_dimension_numbers<[1], [0], [0], [1], [0, 0, 1, 1], [], []>} : vector<13x16xf32>, vector<16x13xf32>, vector<13x13xf32> -> vector<13x13xf32>
    %c3_28 = arith.constant 3 : index
    %c0_29 = arith.constant 0 : index
    %c0_30 = arith.constant 0 : index
    %27 = vector.load %arg4[%c3_28, %c0_29, %c0_30] : memref<4x13x13xf32, #tpu.memory_space<vmem>>, vector<1x13x13xf32>
    %28 = vector.shape_cast %27 : vector<1x13x13xf32> to vector<13x13xf32>
    %29 = vector.shape_cast %26 : vector<13x13xf32> to vector<1x13x13xf32>
    tpu.vector_store %arg4[%c3_28, %c0_29, %c0_30], %29 {strides = array<i32>} : memref<4x13x13xf32, #tpu.memory_space<vmem>>, vector<1x13x13xf32>,
    return
  }
  func.func @transform_0(%arg0: i32) -> (i32, i32) {
    %c0_i32 = arith.constant 0 : i32
    %c0_i32_0 = arith.constant 0 : i32
    %c0_i32_1 = arith.constant 0 : i32
    return %c0_i32, %c0_i32_0 : i32, i32
  }
  func.func @transform_1(%arg0: i32) -> (i32, i32) {
    %c0_i32 = arith.constant 0 : i32
    %c0_i32_0 = arith.constant 0 : i32
    %c0_i32_1 = arith.constant 0 : i32
    return %c0_i32, %c0_i32_0 : i32, i32
  }
  func.func @transform_2(%arg0: i32) -> (i32, i32, i32) {
    %c0_i32 = arith.constant 0 : i32
    %c0_i32_0 = arith.constant 0 : i32
    %c0_i32_1 = arith.constant 0 : i32
    return %arg0, %c0_i32, %c0_i32_0 : i32, i32, i32
  }
  func.func @transform_3(%arg0: i32) -> (i32, i32, i32) {
    %c0_i32 = arith.constant 0 : i32
    %c0_i32_0 = arith.constant 0 : i32
    %c0_i32_1 = arith.constant 0 : i32
    return %arg0, %c0_i32, %c0_i32_0 : i32, i32, i32
  }
}

</mosaic_0001>

<bundles_post_ra>
// kernel: tpu_custom_call.1
= control target key start
LH: loop header
LB: loop body
LE: loop exit
PB: predicated region body
PF: predicated region fallthrough
CT: control target
= control target key end

     0   :  { %8 = vsyncpa [#allocation3], 0  ;;  %s968_s0 = inlined_call_operand.hbm [shape: f32[13,16], index: 0, kind: input, shape index: {}]   ;;  %s969_s1 = inlined_call_operand.hbm [shape: f32[16,13], index: 1, kind: input, shape index: {}]   ;;  %s970_s2 = inlined_call_operand.hbm [shape: f32[8,16,16], index: 2, kind: input, shape index: {}]   ;;  %s971_s3 = inlined_call_operand.vmem [shape: f32[8,13,13], index: 3, kind: output, shape index: {}]  }
   0x1   :  { %9 = vsyncpa [#allocation5], 0  ;;  %s830_s12 = smov 0   ;;  %s832_s13 = smov 0  }
   0x2   :  { %s834_s14 = smov 0   ;;  %s836_s15 = smov 0  }
   0x3 LB: > { %s849_s16 = sadd.s32 4294967295, %s804_s15   ;;  %p77_p0 = scmp.ne.s32.totalorder %s796_s13, %s792_s12  ;;  %s804_s15 = sphi %s836_s15, %s978_s15   ;;  %s800_s14 = sphi %s834_s14, %s977_s14   ;;  %s796_s13 = sphi %s832_s13, %s976_s13   ;;  %s792_s12 = sphi %s830_s12, %s975_s12  }
   0x4   : > { %p78_p1 = scmp.eq.s32.totalorder %s849_s16, 0  ;;  %p562_p2 = scmp.ge.s32.totalorder %s804_s15, 1 }
   0x5   : > { %p114_p3 = scmp.lt.s32.totalorder %s804_s15, 3  ;;  %s125_s20 = sshll.u32 %s968_s0, 4  ;;  %s126_s20 = int_to_ptr.hbm [resolvable:$true] %s125_s20 }
   0x6   : > { %p857_p4 = por %p78_p1, %p77_p0  ;;  %s806_s22 = smov [#allocation2]  }
   0x7   : > { %p864_p5 = pnand %p562_p2, %p114_p3  ;;  %s127_s23 = sshll.u32 %s806_s22, 4  ;;  %s128_s23 = int_to_ptr.vmem [resolvable:$true] %s127_s23 }
   0x8   : > { %s139_s26 = sshll.u32 %s969_s1, 4  ;;  %s807_s27 = smov 128   ;;  %s140_s26 = int_to_ptr.hbm [resolvable:$true] %s139_s26 }
   0x9   : > { %p620_p6 = pneg %p864_p5  ;;  %s808_s28 = smov 8  }
   0xa   : > { %s809_s29 = smov [#allocation4]   ;;  %s882_s4 = sadd.s32 1, %s804_s15  }
   0xb   : > { %p621_p7 = pnand %p620_p6, %p78_p1  ;;  %s141_s30 = sshll.u32 %s809_s29, 4  ;;  %s142_s30 = int_to_ptr.vmem [resolvable:$true] %s141_s30 }
   0xc   : > { %s64_s5 = sadd.s32 1, %s800_s14  ;;  %s61_s6 = ssub.s32 %s804_s15, %s882_s4 }
   0xd   : > { %623 = dma.hbm_to_vmem [thread:$0]  (!%p621_p7), %s126_s20, 256, %s128_s23, [#allocation3], %s807_s27, %s807_s27, %s808_s28  }
   0xe   : > { %626 = dma.hbm_to_vmem [thread:$0]  (!%p621_p7), %s140_s26, 256, %s142_s30, [#allocation5], %s807_s27, %s807_s27, %s808_s28  }
   0xf   : > { %p71_p8 = scmp.ne.s32.totalorder %s800_s14, %s796_s13  ;;  %p62_p9 = scmp.eq.s32.totalorder %s61_s6, 0 }
  0x10   : > { %p72_p10 = scmp.eq.s32.totalorder %s804_s15, 0  ;;  %p633_p11 = scmp.lt.s32.totalorder %s804_s15, 2 }
  0x11   : > { %s155_s7 = sand.u32 1, %s804_s15   ;;  %s157_s9 = sand.u32 1, %s800_s14  }
  0x12   : > { %s893_s8 = scalar_select %p62_p9, %s800_s14, %s64_s5  }
  0x13   : > { %p73_p12 = por %p72_p10, %p71_p8  ;;  %s608_s10 = sshll.u32 %s804_s15, 6 }
  0x14   : > { %s566_s11 = sshll.u32 %s157_s9, 6  ;;  %s165_s19 = scalar_lea.hbm %s970_s2, %s608_s10 }
  0x15   : > { %s166_s20 = sshll.u32 %s165_s19, 4  ;;  %s159_s22 = scalar_lea.vmem [#allocation6], %s566_s11  ;;  %s167_s20 = int_to_ptr.hbm [resolvable:$true] %s166_s20 }
  0x16   : > { %s168_s23 = sshll.u32 %s159_s22, 4  ;;  %p902_p13 = pnand %p633_p11, %p73_p12  ;;  %s169_s23 = int_to_ptr.vmem [resolvable:$true] %s168_s23 }
  0x17   : > { %s156_s25 = scalar_lea.sflag [#allocation3], %s155_s7  ;;  %s732_s26 = sshra.s32 %s167_s20, 4  ;;  %s733_s26 = int_to_ptr.hbm [resolvable:$true] %s732_s26 }
  0x18   : > { %s734_s29 = scalar_lea.hbm %s733_s26, 64  ;;  %p736_p2 = pneg %p902_p13 }
  0x19   : > { %p735_p0 = scmp.ne.s32.totalorder %s733_s26, %s734_s29  ;;  %s739_s6 = scalar_lea.hbm %s970_s2, 128 }
  0x1a   : > { %p740_p7 = scmp.lt.s32.totalorder %s733_s26, %s970_s2  ;;  %p741_p8 = scmp.lt.s32.totalorder %s739_s6, %s734_s29 }
  0x1b   : > { %p737_p3 = pnand %p736_p2, %p735_p0 }
  0x1c   : > { %p742_p9 = por %p741_p8, %p740_p7 }
  0x1d   : > { %p738_p6 = pneg %p737_p3 }
  0x1f   : > { %p743_p10 = pnand %p742_p9, %p738_p6 }
  0x21   : > { %746 = shalt.err (!%p743_p10)
}
  0x22   : > { %630 = dma.hbm_to_vmem [thread:$0]  (!%p902_p13), %s167_s20, 1024, %s169_s23, %s156_s25, %s807_s27, %s807_s27, %s808_s28  }
  0x23   : > { %180 = sbr.rel (%p864_p5) target bundleno = 340 (0x154), region = 32 }
  0x28   : > { %779 = dma.done.wait (%p78_p1), [#allocation3], 256  }
  0x29   : > { %781 = vsyncadd (%p78_p1), [#allocation3], 4294967040 }
  0x2a   : > { %783 = dma.done.wait (%p78_p1), [#allocation5], 256  }
  0x2b   : > { %785 = vsyncadd (%p78_p1), [#allocation5], 4294967040  ;;  %s192_s7 = sand.u32 1, %s849_s16   ;;  %s194_s27 = sand.u32 1, %s796_s13  }
  0x2c   : > { %s573_s28 = sshll.u32 %s194_s27, 6  ;;  %s193_s21 = scalar_lea.sflag [#allocation3], %s192_s7 }
  0x2d   : > { %s196_s10 = scalar_lea.vmem [#allocation6], %s573_s28 }
  0x2e   : > { %787 = dma.done.wait (%p857_p4), %s193_s21, 1024  }
  0x2f   : > { %789 = vsyncadd (%p857_p4), %s193_s21, 4294966272  ;;  %v582_v0 = vld [vmem:[%s196_s10 + $0x18] sm:$0xff]  ;;  %v581_v1 = vld [vmem:[%s196_s10 + $0x10] sm:$0xff]  ;;  %vm235_vm0 = vcmask 130048   ;;  %s574_s17 = sshll.u32 %s849_s16, 2  ;;  %vm294_vm1 = vcmask 105472  }
  0x30   : > { %315 = vmatpush.msra.mxu2 %v582_v0  ;;  %v229_v2 = vld [vmem:[#allocation2] sm:$0xff]  ;;  %v234_v3 = vld [vmem:[%s196_s10 + $0x8] sm:$0xff]  ;;  %v598_v4 = vld [vmem:[%s196_s10 + $0x38] sm:$0xff]  ;;  %p223_p1 = scmp.lt.s32.totalorder %s574_s17, 7  ;;  %vm296_vm2 = vcmask 102400  }
  0x31   : > { %256 = vmatpush.msra.mxu0 %v234_v3  ;;  %v233_v5 = vld [vmem:[%s196_s10] sm:$0xff]  ;;  %v590_v6 = vld [vmem:[%s196_s10 + $0x28] sm:$0xff]  ;;  %v232_v7 = vld [vmem:[#allocation4 + $0x8] sm:$0xff] }
  0x32   : > { %316 = vmatpush.msra.mxu2 %v581_v1  ;;  %v597_v8 = vld [vmem:[%s196_s10 + $0x30] sm:$0xff]  ;;  %v589_v9 = vld [vmem:[%s196_s10 + $0x20] sm:$0xff]  ;;  %344 = vmatpush.msra.mxu3 %v232_v7  ;;  %v230_v10 = vld [vmem:[#allocation2 + $0x8] sm:$0x1f]  ;;  %s980_s17 = smov (!%p223_p1, %s574_s17), 7 }
  0x33   : > { %583 = vmatmul.msk.f32.vlgmr.msra.gmra.mxu2 %vm235_vm0, %v229_v2  ;;  %257 = vmatpush.msra.mxu0 %v233_v5  ;;  %v231_v11 = vld [vmem:[#allocation4] sm:$0xff]  ;;  %s609_s11 = sshll.u32 %s980_s17, 4 }
  0x34   : > { %431 = vmatpush.msrb.mxu2 %v598_v4  ;;  %577 = vmatmul.msk.f32.vlgmr.msra.gmra.mxu0 %vm235_vm0, %v229_v2  ;;  %s227_s19 = scalar_lea.vmem %s971_s3, %s609_s11 }
  0x35   : > { %373 = vmatpush.msrb.mxu0 %v590_v6  ;;  %285 = vmatpush.msra.mxu1 %v232_v7 }
  0x36   : > { %432 = vmatpush.msrb.mxu2 %v597_v8  ;;  %345 = vmatpush.msra.mxu3 %v231_v11 }
  0x37   : > { %374 = vmatpush.msrb.mxu0 %v589_v9  ;;  %286 = vmatpush.msra.mxu1 %v231_v11 }
  0x38   : > { %460 = vmatpush.msrb.mxu3 %v232_v7 }
  0x39   : > { %402 = vmatpush.msrb.mxu1 %v232_v7 }
  0x3a   : > { %461 = vmatpush.msrb.mxu3 %v231_v11 }
  0x3b   : > { %584 = vmatmul.msk.f32.gmra.mxu2 %vm235_vm0, %v230_v10  ;;  %403 = vmatpush.msrb.mxu1 %v231_v11 }
  0x3c   : > { %578 = vmatmul.msk.f32.gmra.mxu0 %vm235_vm0, %v230_v10 }
  0x43   : > { %599 = vmatmul.msk.f32.vlgmr.msrb.gmra.mxu2 %vm235_vm0, %v229_v2 }
  0x44   : > { %591 = vmatmul.msk.f32.vlgmr.msrb.gmra.mxu0 %vm235_vm0, %v229_v2 }
  0x4b   : > { %600 = vmatmul.msk.f32.gmra.mxu2 %vm235_vm0, %v230_v10 }
  0x4c   : > { %592 = vmatmul.msk.f32.gmra.mxu0 %vm235_vm0, %v230_v10 }
  0xb1   : > { %v259_v12 = vpop.f32.mrf.mxu0 }
  0xb2   : > { %579 = vmatmul.msk.f32.vlgmr.msra.gmra.mxu1 %vm235_vm0, %v259_v12 }
  0xb6   : > { %v318_v13 = vpop.f32.mrf.mxu2 }
  0xb7   : > { %585 = vmatmul.msk.f32.vlgmr.msra.gmra.mxu3 %vm235_vm0, %v318_v13 }
  0xb9   : > { %v262_v14 = vpop.f32.mrf.mxu0 }
  0xba   : > { %580 = vmatmul.msk.f32.gmra.mxu1 %vm235_vm0, %v262_v14 }
  0xbe   : > { %v321_v15 = vpop.f32.mrf.mxu2 }
  0xbf   : > { %586 = vmatmul.msk.f32.gmra.mxu3 %vm235_vm0, %v321_v15 }
  0xc1   : > { %v376_v16 = vpop.f32.mrf.mxu0 }
  0xc2   : > { %593 = vmatmul.msk.f32.vlgmr.msrb.gmra.mxu1 %vm235_vm0, %v376_v16 }
  0xc6   : > { %v434_v17 = vpop.f32.mrf.mxu2 }
  0xc7   : > { %601 = vmatmul.msk.f32.vlgmr.msrb.gmra.mxu3 %vm235_vm0, %v434_v17 }
  0xc9   : > { %v379_v18 = vpop.f32.mrf.mxu0 }
  0xca   : > { %594 = vmatmul.msk.f32.gmra.mxu1 %vm235_vm0, %v379_v18 }
  0xce   : > { %v437_v19 = vpop.f32.mrf.mxu2 }
  0xcf   : > { %602 = vmatmul.msk.f32.gmra.mxu3 %vm235_vm0, %v437_v19 }
 0x12f   : > { %v288_v20 = vpop.f32.mrf.mxu1 }
 0x130   : > { %295 = vst.msk [vmem:[%s227_s19] sm:$0xff] %vm294_vm1, %v288_v20 }
 0x137   : > { %v291_v21 = vpop.f32.mrf.mxu1 }
 0x138   : > { %297 = vst.msk [vmem:[%s227_s19 + $0x8] sm:$0x1f] %vm296_vm2, %v291_v21 }
 0x13a   : > { %v347_v22 = vpop.f32.mrf.mxu3 }
 0x13b   : > { %587 = vst.msk [vmem:[%s227_s19 + $0x10] sm:$0xff] %vm294_vm1, %v347_v22 }
 0x13f   : > { %v405_v23 = vpop.f32.mrf.mxu1 }
 0x140   : > { %595 = vst.msk [vmem:[%s227_s19 + $0x20] sm:$0xff] %vm294_vm1, %v405_v23 }
 0x142   : > { %v350_v24 = vpop.f32.mrf.mxu3 }
 0x143   : > { %588 = vst.msk [vmem:[%s227_s19 + $0x18] sm:$0x1f] %vm296_vm2, %v350_v24 }
 0x147   : > { %v408_v25 = vpop.f32.mrf.mxu1 }
 0x148   : > { %596 = vst.msk [vmem:[%s227_s19 + $0x28] sm:$0x1f] %vm296_vm2, %v408_v25 }
 0x14a   : > { %v463_v26 = vpop.f32.mrf.mxu3 }
 0x14b   : > { %603 = vst.msk [vmem:[%s227_s19 + $0x30] sm:$0xff] %vm294_vm1, %v463_v26 }
 0x152   : > { %v466_v27 = vpop.f32.mrf.mxu3 }
 0x153   : > { %604 = vst.msk [vmem:[%s227_s19 + $0x38] sm:$0x1f] %vm296_vm2, %v466_v27 }
 0x154 PF: > { %p12_p4 = scmp.ge.s32.totalorder %s882_s4, 4   ;;  %s975_s12 = smov %s796_s13 }
 0x155   : > { %s976_s13 = smov %s800_s14  ;;  %s977_s14 = smov %s893_s8 }
 0x156   : > { %s978_s15 = smov %s882_s4  ;;  %14 = sbr.rel (!%p12_p4) target bundleno = 3 (0x3), region = 85 }
 0x15b   :  { %496 = vsyncpa [#allocation3], 1 }
 0x15c   :  { %498 = vsyncpa [#allocation3 + $0x1], 1 }
 0x15d   :  { %499 = vsyncpa [#allocation5], 1 }

</bundles_post_ra>
